<compile_context>
chip_gen: v7x
topology: tpu7x:2x2x1
jax: 0.10.0
libtpu: 0.0.40
codegen_flags: <defaults>
</compile_context>

<pallas_src>
import math
import jax
import jax.numpy as jnp
from jax import lax
from jax.experimental import pallas as pl
from jax.experimental.pallas import tpu as pltpu

NEIGHBOR_NUM = 4
BN_EPS = 1e-5
COS_EPS = 1e-12


def _gnn_fused_kernel(x_ref, uvw_ref, uvb_ref, gamma_ref, beta_ref, out_ref):
    x = x_ref[...]                                            # (B, N, C) f32
    b, n, c = x.shape

    # --- cosine similarity (detached path in torch) ---
    # x / max(||x||, eps) == x * rsqrt(max(||x||^2, eps^2))   (EUP rsqrt, no divide)
    sumsq = jnp.sum(x * x, axis=-1, keepdims=True)
    xn = x * lax.rsqrt(jnp.maximum(sumsq, COS_EPS * COS_EPS))
    si = jnp.einsum('bic,bjc->bij', xn, xn,
                    preferred_element_type=jnp.float32)       # (B, N, N)

    # --- adjacency via rank counting (replaces iterative 4-round top-k) ---
    # rank[b,i,j] = #{m : si[b,i,m] > si[b,i,j]};  adj = rank < k
    # Each term is a (B,N,1)-vs-(B,N,N) lane-broadcast compare (pure VPU); the only
    # serial dependence is the short accumulation of N adds.
    rank = jnp.zeros((b, n, n), jnp.float32)
    for m in range(n):                                        # unrolled, N small
        rank = rank + (si[:, :, m:m + 1] > si).astype(jnp.float32)
    adj = (rank < float(NEIGHBOR_NUM)).astype(jnp.float32)    # (B, N, N)

    # --- fused U|V linear: one (B*N, C) @ (C, 2C) MXU pass, weights already (in,out) ---
    x2 = x.reshape(b * n, c)
    uv = jnp.dot(x2, uvw_ref[...],
                 preferred_element_type=jnp.float32) + uvb_ref[...]   # (B*N, 2C)
    ux = uv[:, :c].reshape(b, n, c)
    vx = uv[:, c:].reshape(b, n, c)

    # --- normalize_digraph applied as row scalings (no eye / dense D matmuls):
    #     (D^-1/2 A D^-1/2) V(x) = D^-1/2 (A (D^-1/2 V(x))) ---
    deg = jnp.sum(adj, axis=-1, keepdims=True)                # (B, N, 1), >= 1 (self-loop)
    dinv = lax.rsqrt(jnp.maximum(deg, 1.0))
    agg = jnp.einsum('bij,bjc->bic', adj, vx * dinv,
                     preferred_element_type=jnp.float32) * dinv
    y = agg + ux                                              # (B, N, C)

    # --- BatchNorm1d(num_classes), training mode: stats over (batch, channel) ---
    inv_cnt = 1.0 / float(b * c)
    mean = jnp.sum(jnp.sum(y, axis=2, keepdims=True), axis=0, keepdims=True) * inv_cnt
    ctr = y - mean
    var = jnp.sum(jnp.sum(ctr * ctr, axis=2, keepdims=True), axis=0, keepdims=True) * inv_cnt
    yhat = ctr * lax.rsqrt(var + BN_EPS)

    out = x + gamma_ref[...] * yhat + beta_ref[...]
    out_ref[...] = jnp.maximum(out, 0.0).astype(out_ref.dtype)
    # TODO(synk): running_mean / running_var buffer updates (training-mode side
    # effect of nn.BatchNorm1d) are not emitted; the forward output uses batch
    # statistics exactly like torch training mode.


def gnn_forward(x, uw, ub, vw, vb, gamma, beta):
    b, n, c = x.shape
    # Torch (out,in) weights -> (in,out), U|V fused into one (C, 2C) weight and one
    # (1, 2C) bias so the kernel feeds the MXU a single, wider RHS.
    uvw = jnp.concatenate([jnp.transpose(uw), jnp.transpose(vw)], axis=1)  # (C, 2C)
    uvb = jnp.concatenate([ub, vb], axis=0).reshape(1, 2 * c)              # (1, 2C)
    gamma3 = gamma.reshape(1, n, 1)
    beta3 = beta.reshape(1, n, 1)

    vmem = pltpu.MemorySpace.VMEM
    # Grid-less call: whole-array VMEM blocks.  No pipeline prologue/epilogue, no
    # double-buffered operand copies — everything at these shapes is a few KiB.
    return pl.pallas_call(
        _gnn_fused_kernel,
        out_shape=jax.ShapeDtypeStruct((b, n, c), jnp.float32),
        in_specs=[
            pl.BlockSpec(memory_space=vmem),   # x (B, N, C)
            pl.BlockSpec(memory_space=vmem),   # fused U|V weight (C, 2C)
            pl.BlockSpec(memory_space=vmem),   # fused U|V bias (1, 2C)
            pl.BlockSpec(memory_space=vmem),   # bn gamma (1, N, 1)
            pl.BlockSpec(memory_space=vmem),   # bn beta  (1, N, 1)
        ],
        out_specs=pl.BlockSpec(memory_space=vmem),
    )(x, uvw, uvb, gamma3, beta3)


def gnn_reference(x, uw, ub, vw, vb, gamma, beta, k=NEIGHBOR_NUM):
    """Pure-JAX mirror of the torch forward (training mode), for sanity check."""
    b, n, c = x.shape
    xn = x / jnp.maximum(jnp.sqrt(jnp.sum(x * x, -1, keepdims=True)), COS_EPS)
    si = jnp.einsum('bic,bjc->bij', xn, xn)
    thr = jnp.sort(si, axis=-1)[:, :, n - k][..., None]       # k-th largest
    adj = (si >= thr).astype(jnp.float32)
    dinv = jnp.sum(adj, -1) ** -0.5
    a_norm = adj * dinv[:, :, None] * dinv[:, None, :]
    vx = x @ vw.T + vb
    ux = x @ uw.T + ub
    y = jnp.einsum('bij,bjc->bic', a_norm, vx) + ux
    mean = y.mean(axis=(0, 2), keepdims=True)
    var = ((y - mean) ** 2).mean(axis=(0, 2), keepdims=True)
    ybn = gamma.reshape(1, n, 1) * (y - mean) / jnp.sqrt(var + BN_EPS) \
        + beta.reshape(1, n, 1)
    return jnp.maximum(x + ybn, 0.0)


if __name__ == "__main__":
    B, N, C = 2, 8, 32          # batch, num_classes (nodes), in_channels
    key = jax.random.PRNGKey(0)
    kx, ku, kv, kub, kvb = jax.random.split(key, 5)

    x = jax.random.normal(kx, (B, N, C), dtype=jnp.float32)
    std = math.sqrt(2.0 / C)
    uw = std * jax.random.normal(ku, (C, C), dtype=jnp.float32)
    vw = std * jax.random.normal(kv, (C, C), dtype=jnp.float32)
    bound = 1.0 / math.sqrt(C)
    ub = jax.random.uniform(kub, (C,), minval=-bound, maxval=bound, dtype=jnp.float32)
    vb = jax.random.uniform(kvb, (C,), minval=-bound, maxval=bound, dtype=jnp.float32)
    gamma = jnp.ones((N,), jnp.float32)    # bnv.weight.fill_(1)
    beta = jnp.zeros((N,), jnp.float32)    # bnv.bias.zero_()

    out = jax.block_until_ready(gnn_forward(x, uw, ub, vw, vb, gamma, beta))

    ref = gnn_reference(x, uw, ub, vw, vb, gamma, beta)
    if not jnp.allclose(out, ref, atol=1e-2, rtol=1e-2):
        raise AssertionError(
            f"kernel/ref mismatch, max abs diff = {float(jnp.max(jnp.abs(out - ref)))}")
    print("KERNEL_OK")
</pallas_src>

<mosaic_0001>
module attributes {stable_mosaic.version = 11 : i64} {
  func.func @_gnn_fused_kernel(%arg0: memref<2x8x32xf32, #tpu.memory_space<vmem>>, %arg1: memref<32x64xf32, #tpu.memory_space<vmem>>, %arg2: memref<1x64xf32, #tpu.memory_space<vmem>>, %arg3: memref<1x8x1xf32, #tpu.memory_space<vmem>>, %arg4: memref<1x8x1xf32, #tpu.memory_space<vmem>>, %arg5: memref<2x8x32xf32, #tpu.memory_space<vmem>>) attributes {dimension_semantics = [], scalar_prefetch = 0 : i64, scratch_operands = 0 : i64, tpu.core_type = #tpu.core_type<tc>} {
    %c0 = arith.constant 0 : index
    %c0_0 = arith.constant 0 : index
    %c0_1 = arith.constant 0 : index
    %0 = vector.load %arg0[%c0, %c0_0, %c0_1] : memref<2x8x32xf32, #tpu.memory_space<vmem>>, vector<2x8x32xf32>
    %1 = arith.mulf %0, %0 : vector<2x8x32xf32>
    %cst = arith.constant dense<0.000000e+00> : vector<2x8xf32>
    %2 = vector.multi_reduction <add>, %1, %cst [2] : vector<2x8x32xf32> to vector<2x8xf32>
    %3 = vector.shape_cast %2 : vector<2x8xf32> to vector<2x8x1xf32>
    %cst_2 = arith.constant 1.000000e-24 : f32
    %4 = vector.broadcast %cst_2 : f32 to vector<2x8x1xf32>
    %5 = arith.maximumf %3, %4 : vector<2x8x1xf32>
    %6 = math.rsqrt %5 : vector<2x8x1xf32>
    %7 = vector.broadcast %6 : vector<2x8x1xf32> to vector<2x8x32xf32>
    %8 = arith.mulf %0, %7 : vector<2x8x32xf32>
    "tpu.trace_start"() <{level = 10 : i32, message = "bic,bjc->bij"}> : () -> ()
    %cst_3 = arith.constant dense<0.000000e+00> : vector<2x8x8xf32>
    %9 = tpu.matmul %8, %8, %cst_3 {dimension_numbers = #tpu.dot_dimension_numbers<[2], [2], [1], [1], [0, 0, 0, 1, 1, 1], [0], [0]>} : vector<2x8x32xf32>, vector<2x8x32xf32>, vector<2x8x8xf32> -> vector<2x8x8xf32>
    %cst_4 = arith.constant 0.000000e+00 : f32
    "tpu.trace_stop"() : () -> ()
    %10 = vector.broadcast %cst_4 : f32 to vector<2x8x8xf32>
    %11 = vector.extract_strided_slice %9 {offsets = [0, 0, 0], sizes = [2, 8, 1], strides = [1, 1, 1]} : vector<2x8x8xf32> to vector<2x8x1xf32>
    %12 = vector.broadcast %11 : vector<2x8x1xf32> to vector<2x8x8xf32>
    %13 = arith.cmpf ogt, %12, %9 : vector<2x8x8xf32>
    %14 = arith.extui %13 : vector<2x8x8xi1> to vector<2x8x8xi32>
    %15 = arith.sitofp %14 : vector<2x8x8xi32> to vector<2x8x8xf32>
    %16 = arith.addf %10, %15 : vector<2x8x8xf32>
    %17 = vector.extract_strided_slice %9 {offsets = [0, 0, 1], sizes = [2, 8, 1], strides = [1, 1, 1]} : vector<2x8x8xf32> to vector<2x8x1xf32>
    %18 = vector.broadcast %17 : vector<2x8x1xf32> to vector<2x8x8xf32>
    %19 = arith.cmpf ogt, %18, %9 : vector<2x8x8xf32>
    %20 = arith.extui %19 : vector<2x8x8xi1> to vector<2x8x8xi32>
    %21 = arith.sitofp %20 : vector<2x8x8xi32> to vector<2x8x8xf32>
    %22 = arith.addf %16, %21 : vector<2x8x8xf32>
    %23 = vector.extract_strided_slice %9 {offsets = [0, 0, 2], sizes = [2, 8, 1], strides = [1, 1, 1]} : vector<2x8x8xf32> to vector<2x8x1xf32>
    %24 = vector.broadcast %23 : vector<2x8x1xf32> to vector<2x8x8xf32>
    %25 = arith.cmpf ogt, %24, %9 : vector<2x8x8xf32>
    %26 = arith.extui %25 : vector<2x8x8xi1> to vector<2x8x8xi32>
    %27 = arith.sitofp %26 : vector<2x8x8xi32> to vector<2x8x8xf32>
    %28 = arith.addf %22, %27 : vector<2x8x8xf32>
    %29 = vector.extract_strided_slice %9 {offsets = [0, 0, 3], sizes = [2, 8, 1], strides = [1, 1, 1]} : vector<2x8x8xf32> to vector<2x8x1xf32>
    %30 = vector.broadcast %29 : vector<2x8x1xf32> to vector<2x8x8xf32>
    %31 = arith.cmpf ogt, %30, %9 : vector<2x8x8xf32>
    %32 = arith.extui %31 : vector<2x8x8xi1> to vector<2x8x8xi32>
    %33 = arith.sitofp %32 : vector<2x8x8xi32> to vector<2x8x8xf32>
    %34 = arith.addf %28, %33 : vector<2x8x8xf32>
    %35 = vector.extract_strided_slice %9 {offsets = [0, 0, 4], sizes = [2, 8, 1], strides = [1, 1, 1]} : vector<2x8x8xf32> to vector<2x8x1xf32>
    %36 = vector.broadcast %35 : vector<2x8x1xf32> to vector<2x8x8xf32>
    %37 = arith.cmpf ogt, %36, %9 : vector<2x8x8xf32>
    %38 = arith.extui %37 : vector<2x8x8xi1> to vector<2x8x8xi32>
    %39 = arith.sitofp %38 : vector<2x8x8xi32> to vector<2x8x8xf32>
    %40 = arith.addf %34, %39 : vector<2x8x8xf32>
    %41 = vector.extract_strided_slice %9 {offsets = [0, 0, 5], sizes = [2, 8, 1], strides = [1, 1, 1]} : vector<2x8x8xf32> to vector<2x8x1xf32>
    %42 = vector.broadcast %41 : vector<2x8x1xf32> to vector<2x8x8xf32>
    %43 = arith.cmpf ogt, %42, %9 : vector<2x8x8xf32>
    %44 = arith.extui %43 : vector<2x8x8xi1> to vector<2x8x8xi32>
    %45 = arith.sitofp %44 : vector<2x8x8xi32> to vector<2x8x8xf32>
    %46 = arith.addf %40, %45 : vector<2x8x8xf32>
    %47 = vector.extract_strided_slice %9 {offsets = [0, 0, 6], sizes = [2, 8, 1], strides = [1, 1, 1]} : vector<2x8x8xf32> to vector<2x8x1xf32>
    %48 = vector.broadcast %47 : vector<2x8x1xf32> to vector<2x8x8xf32>
    %49 = arith.cmpf ogt, %48, %9 : vector<2x8x8xf32>
    %50 = arith.extui %49 : vector<2x8x8xi1> to vector<2x8x8xi32>
    %51 = arith.sitofp %50 : vector<2x8x8xi32> to vector<2x8x8xf32>
    %52 = arith.addf %46, %51 : vector<2x8x8xf32>
    %53 = vector.extract_strided_slice %9 {offsets = [0, 0, 7], sizes = [2, 8, 1], strides = [1, 1, 1]} : vector<2x8x8xf32> to vector<2x8x1xf32>
    %54 = vector.broadcast %53 : vector<2x8x1xf32> to vector<2x8x8xf32>
    %55 = arith.cmpf ogt, %54, %9 : vector<2x8x8xf32>
    %56 = arith.extui %55 : vector<2x8x8xi1> to vector<2x8x8xi32>
    %57 = arith.sitofp %56 : vector<2x8x8xi32> to vector<2x8x8xf32>
    %58 = arith.addf %52, %57 : vector<2x8x8xf32>
    %cst_5 = arith.constant 4.000000e+00 : f32
    %59 = vector.broadcast %cst_5 : f32 to vector<2x8x8xf32>
    %60 = arith.cmpf olt, %58, %59 : vector<2x8x8xf32>
    %61 = arith.extui %60 : vector<2x8x8xi1> to vector<2x8x8xi32>
    %62 = arith.sitofp %61 : vector<2x8x8xi32> to vector<2x8x8xf32>
    %63 = vector.shape_cast %0 : vector<2x8x32xf32> to vector<16x32xf32>
    %c0_6 = arith.constant 0 : index
    %c0_7 = arith.constant 0 : index
    %64 = vector.load %arg1[%c0_6, %c0_7] : memref<32x64xf32, #tpu.memory_space<vmem>>, vector<32x64xf32>
    %cst_8 = arith.constant dense<0.000000e+00> : vector<16x64xf32>
    %65 = tpu.matmul %63, %64, %cst_8 {dimension_numbers = #tpu.dot_dimension_numbers<[1], [0], [0], [1], [0, 0, 1, 1], [], []>} : vector<16x32xf32>, vector<32x64xf32>, vector<16x64xf32> -> vector<16x64xf32>
    %c0_9 = arith.constant 0 : index
    %c0_10 = arith.constant 0 : index
    %66 = vector.load %arg2[%c0_9, %c0_10] : memref<1x64xf32, #tpu.memory_space<vmem>>, vector<1x64xf32>
    %67 = vector.broadcast %66 : vector<1x64xf32> to vector<16x64xf32>
    %68 = arith.addf %65, %67 : vector<16x64xf32>
    %69 = vector.extract_strided_slice %68 {offsets = [0, 0], sizes = [16, 32], strides = [1, 1]} : vector<16x64xf32> to vector<16x32xf32>
    %70 = vector.shape_cast %69 : vector<16x32xf32> to vector<2x8x32xf32>
    %71 = vector.extract_strided_slice %68 {offsets = [0, 32], sizes = [16, 32], strides = [1, 1]} : vector<16x64xf32> to vector<16x32xf32>
    %72 = vector.shape_cast %71 : vector<16x32xf32> to vector<2x8x32xf32>
    %cst_11 = arith.constant dense<0.000000e+00> : vector<2x8xf32>
    %73 = vector.multi_reduction <add>, %62, %cst_11 [2] : vector<2x8x8xf32> to vector<2x8xf32>
    %74 = vector.shape_cast %73 : vector<2x8xf32> to vector<2x8x1xf32>
    %cst_12 = arith.constant 1.000000e+00 : f32
    %75 = vector.broadcast %cst_12 : f32 to vector<2x8x1xf32>
    %76 = arith.maximumf %74, %75 : vector<2x8x1xf32>
    %77 = math.rsqrt %76 : vector<2x8x1xf32>
    %78 = vector.broadcast %77 : vector<2x8x1xf32> to vector<2x8x32xf32>
    %79 = arith.mulf %72, %78 : vector<2x8x32xf32>
    "tpu.trace_start"() <{level = 10 : i32, message = "bij,bjc->bic"}> : () -> ()
    %cst_13 = arith.constant dense<0.000000e+00> : vector<2x8x32xf32>
    %80 = tpu.matmul %62, %79, %cst_13 {dimension_numbers = #tpu.dot_dimension_numbers<[2], [1], [1], [2], [0, 0, 0, 1, 1, 2], [0], [0]>} : vector<2x8x8xf32>, vector<2x8x32xf32>, vector<2x8x32xf32> -> vector<2x8x32xf32>
    "tpu.trace_stop"() : () -> ()
    %81 = vector.broadcast %77 : vector<2x8x1xf32> to vector<2x8x32xf32>
    %82 = arith.mulf %80, %81 : vector<2x8x32xf32>
    %83 = arith.addf %82, %70 : vector<2x8x32xf32>
    %cst_14 = arith.constant dense<0.000000e+00> : vector<2x8xf32>
    %84 = vector.multi_reduction <add>, %83, %cst_14 [2] : vector<2x8x32xf32> to vector<2x8xf32>
    %85 = vector.shape_cast %84 : vector<2x8xf32> to vector<2x8x1xf32>
    %cst_15 = arith.constant dense<0.000000e+00> : vector<8x1xf32>
    %86 = vector.multi_reduction <add>, %85, %cst_15 [0] : vector<2x8x1xf32> to vector<8x1xf32>
    %87 = vector.shape_cast %86 : vector<8x1xf32> to vector<1x8x1xf32>
    %cst_16 = arith.constant 1.562500e-02 : f32
    %88 = vector.broadcast %cst_16 : f32 to vector<1x8x1xf32>
    %89 = arith.mulf %87, %88 : vector<1x8x1xf32>
    %90 = vector.broadcast %89 : vector<1x8x1xf32> to vector<2x8x32xf32>
    %91 = arith.subf %83, %90 : vector<2x8x32xf32>
    %92 = arith.mulf %91, %91 : vector<2x8x32xf32>
    %cst_17 = arith.constant dense<0.000000e+00> : vector<2x8xf32>
    %93 = vector.multi_reduction <add>, %92, %cst_17 [2] : vector<2x8x32xf32> to vector<2x8xf32>
    %94 = vector.shape_cast %93 : vector<2x8xf32> to vector<2x8x1xf32>
    %cst_18 = arith.constant dense<0.000000e+00> : vector<8x1xf32>
    %95 = vector.multi_reduction <add>, %94, %cst_18 [0] : vector<2x8x1xf32> to vector<8x1xf32>
    %96 = vector.shape_cast %95 : vector<8x1xf32> to vector<1x8x1xf32>
    %cst_19 = arith.constant 1.562500e-02 : f32
    %97 = vector.broadcast %cst_19 : f32 to vector<1x8x1xf32>
    %98 = arith.mulf %96, %97 : vector<1x8x1xf32>
    %cst_20 = arith.constant 9.99999974E-6 : f32
    %99 = vector.broadcast %cst_20 : f32 to vector<1x8x1xf32>
    %100 = arith.addf %98, %99 : vector<1x8x1xf32>
    %101 = math.rsqrt %100 : vector<1x8x1xf32>
    %102 = vector.broadcast %101 : vector<1x8x1xf32> to vector<2x8x32xf32>
    %103 = arith.mulf %91, %102 : vector<2x8x32xf32>
    %c0_21 = arith.constant 0 : index
    %c0_22 = arith.constant 0 : index
    %c0_23 = arith.constant 0 : index
    %104 = vector.load %arg3[%c0_21, %c0_22, %c0_23] : memref<1x8x1xf32, #tpu.memory_space<vmem>>, vector<1x8x1xf32>
    %105 = vector.broadcast %104 : vector<1x8x1xf32> to vector<2x8x32xf32>
    %106 = arith.mulf %105, %103 : vector<2x8x32xf32>
    %107 = arith.addf %0, %106 : vector<2x8x32xf32>
    %c0_24 = arith.constant 0 : index
    %c0_25 = arith.constant 0 : index
    %c0_26 = arith.constant 0 : index
    %108 = vector.load %arg4[%c0_24, %c0_25, %c0_26] : memref<1x8x1xf32, #tpu.memory_space<vmem>>, vector<1x8x1xf32>
    %109 = vector.broadcast %108 : vector<1x8x1xf32> to vector<2x8x32xf32>
    %110 = arith.addf %107, %109 : vector<2x8x32xf32>
    %cst_27 = arith.constant 0.000000e+00 : f32
    %111 = vector.broadcast %cst_27 : f32 to vector<2x8x32xf32>
    %112 = arith.maximumf %110, %111 : vector<2x8x32xf32>
    %c0_28 = arith.constant 0 : index
    %c0_29 = arith.constant 0 : index
    %c0_30 = arith.constant 0 : index
    %113 = vector.load %arg5[%c0_28, %c0_29, %c0_30] : memref<2x8x32xf32, #tpu.memory_space<vmem>>, vector<2x8x32xf32>
    tpu.vector_store %arg5[%c0_28, %c0_29, %c0_30], %112 {strides = array<i32>} : memref<2x8x32xf32, #tpu.memory_space<vmem>>, vector<2x8x32xf32>,
    return
  }
}

</mosaic_0001>

<bundles_post_ra>
// kernel: tpu_custom_call.1
= control target key start
LH: loop header
LB: loop body
LE: loop exit
PB: predicated region body
PF: predicated region fallthrough
CT: control target
= control target key end

     0   :  { %10 = vsyncpa [#allocation3], 0  ;;  %s1022_s0 = inlined_call_operand.vmem [shape: f32[2,8,32], index: 0, kind: input, shape index: {}]   ;;  %s1023_s1 = inlined_call_operand.hbm [shape: f32[32,64], index: 1, kind: input, shape index: {}]   ;;  %s1024_s2 = inlined_call_operand.vmem [shape: f32[1,64], index: 2, kind: input, shape index: {}]   ;;  %s1025_s3 = inlined_call_operand.vmem [shape: f32[1,8,1], index: 3, kind: input, shape index: {}]   ;;  %s1026_s4 = inlined_call_operand.vmem [shape: f32[1,8,1], index: 4, kind: input, shape index: {}]   ;;  %s1027_s5 = inlined_call_operand.hbm [shape: f32[2,8,32], index: 5, kind: output, shape index: {}]  }
   0x1   :  { %11 = vsyncpa [#allocation4], 0  ;;  %s830_s18 = smov [#allocation2]   ;;  %s782_s22 = scalar_lea.hbm %s1023_s1, 512 }
   0x2   :  { %s19_s19 = sshll.u32 %s830_s18, 4  ;;  %p783_p0 = scmp.ne.s32.totalorder %s1023_s1, %s782_s22  ;;  %s20_s19 = int_to_ptr.vmem [resolvable:$true] %s19_s19 }
   0x3   :  { %p786_p1 = scmp.lt.u32.totalorder %s782_s22, %s1023_s1 }
   0x5   :  { %p788_p2 = pnand %p786_p1, %p783_p0 }
   0x7   :  { %791 = shalt.err (!%p788_p2)
}
   0x8   :  { %s792_s27 = scalar_lea.vmem %s20_s19, 512  ;;  %p797_p4 = scmp.lt.s32.totalorder %s20_s19, %s20_s19 }
   0x9   :  { %p793_p3 = scmp.ne.s32.totalorder %s20_s19, %s792_s27  ;;  %p798_p5 = scmp.lt.s32.totalorder %s792_s27, %s792_s27 }
   0xb   :  { %p799_p6 = por %p798_p5, %p797_p4 }
   0xd   :  { %p800_p7 = pnand %p799_p6, %p793_p3 }
   0xf   :  { %803 = shalt.err (!%p800_p7)
}
  0x10   :  { %s831_s28 = smov 128   ;;  %s832_s29 = smov 8  }
  0x11   :  { %25 = dma.hbm_to_vmem [thread:$0]  %s1023_s1, 512, %s20_s19, [#allocation3], %s831_s28, %s831_s28, %s832_s29  }
  0x12   :  { %826 = dma.done.wait [#allocation3], 512  }
  0x13   :  { %827 = vsyncadd [#allocation3], 4294966784  ;;  %v893_v0 = vld [vmem:[%s1022_s0] sm:$0xff]  ;;  %vm39_vm0 = vcmask 261120   ;;  %v898_v1 = vld [vmem:[%s1022_s0 + $0x8] sm:$0xff]  ;;  %v833_v6 = vmov 0.0  }
  0x14   :  { %v37_v2 = vmul.f32 %v893_v0, %v893_v0  ;;  %v38_v3 = vmul.f32 %v898_v1, %v898_v1  ;;  %701 = vmatprep.subr.mxu0 %v833_v6  ;;  %706 = vmatprep.subr.mxu1 %v833_v6  ;;  %vm834_vm1 = vmmov 0   ;;  %v835_v7 = vmov 2   ;;  %v334_v17 = vld [vmem:[#allocation2] sm:$0xff]  ;;  %v335_v18 = vld [vmem:[#allocation2 + $0x8] sm:$0xff]  ;;  %v336_v21 = vld [vmem:[#allocation2 + $0x10] sm:$0xff]  ;;  %s843_s11 = smov 96  }
  0x15   :  { %703 = vmatprep.mubr.msk.f32.mxu0 %vm834_vm1, %v833_v6  ;;  %708 = vmatprep.mubr.msk.f32.mxu1 %vm834_vm1, %v833_v6  ;;  %v836_v8 = vmov 0   ;;  %v732_v19 = vpack.c.bf16 %v335_v18, %v334_v17  ;;  %v337_v22 = vld [vmem:[#allocation2 + $0x18] sm:$0xff]  ;;  %v837_v26 = vmov 6   ;;  %v838_v27 = vmov 1  }
  0x16   :  { %v40_v4 = vsel %vm39_vm0, %v37_v2, 0.0  ;;  %v43_v5 = vsel %vm39_vm0, %v38_v3, 0.0  ;;  %757 = vset.pattern.permute.xlu0 %v835_v7  ;;  %755 = vset.pattern.permute.xlu1 %v836_v8  ;;  %v736_v24 = vpack.c.bf16 %v337_v22, %v336_v21  ;;  %v839_v29 = vmov 3  }
  0x17   :  { %41 = vadd.xlane.f32.xlu0 %v40_v4  ;;  %v840_v30 = vmov 4   ;;  %v841_v31 = vmov 5   ;;  %v842_v32 = vmov 7  }
  0x1b   :  { %44 = vadd.xlane.f32.xlu0 %v43_v5 }
  0xa4   :  { %v42_v9 = vpop.xlane.xlu0 %41 }
  0xa5   :  { %v46_v10 = vmax.f32 %v42_v9, 1e-24 }
  0xa7   :  { %772 = vrsqrt.f32 %v46_v10 }
  0xa8   :  { %v45_v11 = vpop.xlane.xlu0 %44 }
  0xa9   :  { %v47_v12 = vmax.f32 %v45_v11, 1e-24 }
  0xab   :  { %774 = vrsqrt.f32 %v47_v12 }
  0xb1   :  { %v773_v13 = vpop.eup %772 }
  0xb2   :  { %v50_v14 = vmul.f32 %v773_v13, %v893_v0 }
  0xb4   :  { %702 = vmatpush3.xpose.msk.msra.mxu0 %vm39_vm0, %v50_v14 }
  0xb5   :  { %v775_v15 = vpop.eup %774  ;;  %733 = vmatprep.subr.bf16.mxu0 %v732_v19 }
  0xb6   :  { %v51_v16 = vmul.f32 %v775_v15, %v898_v1 }
  0xb7   :  { %704 = vmatmul.mubr.msk.f32.vlgmr.msra.gmra.mrb[0].mxu0 %vm39_vm0, %v50_v14 }
  0xb8   :  { %707 = vmatpush3.xpose.msk.msra.mxu1 %vm39_vm0, %v51_v16  ;;  %719 = vmatprep.mubr.msk.f32.mxu0 %vm39_vm0, %v893_v0 }
  0xb9   :  { %722 = vmatprep.subr.mxu1 %v833_v6  ;;  %735 = vmatpush3.bf16.msra.mxu0 %v732_v19 }
  0xba   :  { %737 = vmatprep.subr.bf16.mxu0 %v736_v24 }
  0xbb   :  { %709 = vmatmul.mubr.msk.f32.vlgmr.msra.gmra.mrb[0].mxu1 %vm39_vm0, %v51_v16 }
  0xbc   :  { %724 = vmatprep.mubr.msk.f32.mxu1 %vm834_vm1, %v833_v6 }
  0xbd   :  { %739 = vmatpush3.bf16.msra.mxu0 %v736_v24 }
  0xc0   :  { %720 = vmatmul.mubr.msk.f32.vlgmr.msra.gmra.mrb[2].mxu0 %vm39_vm0, %v898_v1 }
 0x18a   :  { %v924_v20 = vpop.f32.mrb[0].mxu0 }
 0x18b   :  { %233 = vperm.xlu0 %757, %v924_v20   ;;  %200 = vperm.xlu1 %755, %v924_v20   ;;  %v705_v23 = vpop.f32.mrb[1].mxu0 }
 0x18e   :  { %v928_v25 = vpop.f32.mrb[0].mxu1 }
 0x18f   :  { %769 = vset.pattern.permute.xlu0 %v837_v26  ;;  %756 = vset.pattern.permute.xlu1 %v838_v27  ;;  %v710_v28 = vpop.f32.mrb[1].mxu1 }
 0x190   :  { %217 = vperm.xlu1 %756, %v924_v20   ;;  %301 = vperm.xlu0 %769, %v928_v25   ;;  %v682_v28 = vld [vmem:[%s1024_s2] ss:$0 sm:$0xff] }
 0x193   :  { %v721_v22 = vpop.f32.mrb[2].mxu0 }
 0x194   :  { %758 = vset.pattern.permute.xlu1 %v836_v8  ;;  %770 = vset.pattern.permute.xlu0 %v836_v8  ;;  %v417_v23 = vpop.f32.mrb[3].mxu0 }
 0x195   :  { %205 = vperm.xlu1 %758, %v928_v25  }
 0x199   :  { %759 = vset.pattern.permute.xlu1 %v838_v27 }
 0x19a   :  { %221 = vperm.xlu1 %759, %v928_v25  }
 0x19e   :  { %760 = vset.pattern.permute.xlu1 %v839_v29 }
 0x19f   :  { %249 = vperm.xlu1 %760, %v924_v20  }
 0x1a3   :  { %761 = vset.pattern.permute.xlu1 %v835_v7 }
 0x1a4   :  { %237 = vperm.xlu1 %761, %v928_v25  }
 0x1a8   :  { %762 = vset.pattern.permute.xlu1 %v840_v30 }
 0x1a9   :  { %265 = vperm.xlu1 %762, %v924_v20  }
 0x1ad   :  { %763 = vset.pattern.permute.xlu1 %v839_v29  ;;  %v418_v29 = vadd.f32 %v682_v28, %v417_v23 }
 0x1ae   :  { %253 = vperm.xlu1 %763, %v928_v25  }
 0x1b2   :  { %764 = vset.pattern.permute.xlu1 %v841_v31 }
 0x1b3   :  { %281 = vperm.xlu1 %764, %v924_v20  }
 0x1b7   :  { %765 = vset.pattern.permute.xlu1 %v840_v30 }
 0x1b8   :  { %269 = vperm.xlu1 %765, %v928_v25  }
 0x1bc   :  { %766 = vset.pattern.permute.xlu1 %v837_v26 }
 0x1bd   :  { %297 = vperm.xlu1 %766, %v924_v20  }
 0x1c1   :  { %767 = vset.pattern.permute.xlu1 %v841_v31 }
 0x1c2   :  { %285 = vperm.xlu1 %767, %v928_v25  }
 0x1c6   :  { %768 = vset.pattern.permute.xlu1 %v842_v32  ;;  %v423_v32 = vadd.f32 %v721_v22, %v682_v28 }
 0x1c7   :  { %313 = vperm.xlu1 %768, %v924_v20  }
 0x1cb   :  { %317 = vperm.xlu1 %768, %v928_v25  }
 0x1cf   :  { %771 = vset.pattern.permute.xlu1 %v836_v8 }
 0x20a   :  { %v201_v33 = vpop.permute.xlu1 %200  ;;  %v234_v42 = vpop.permute.xlu0 %233 }
 0x20b   :  { %vm208_vm3 = vcmp.gt.f32.partialorder %v201_v33, %v924_v20  ;;  %vm240_vm5 = vcmp.gt.f32.partialorder %v234_v42, %v924_v20 }
 0x20c   :  { %v664_v45 = vsel %vm208_vm3, 1.0, %v833_v6  ;;  %v668_v49 = vsel %vm240_vm5, 1.0, %v833_v6  ;;  %vm426_vm3 = vcmask 64512  }
 0x20f   :  { %v218_v34 = vpop.permute.xlu1 %217  ;;  %v302_v2 = vpop.permute.xlu0 %301 }
 0x210   :  { %vm224_vm2 = vcmp.gt.f32.partialorder %v218_v34, %v924_v20  ;;  %vm305_vm15 = vcmp.gt.f32.partialorder %v302_v2, %v928_v25 }
 0x211   :  { %v666_v44 = vsel %vm224_vm2, 1.0, %v833_v6  ;;  %v677_v13 = vsel %vm305_vm15, 1.0, %v833_v6 }
 0x212   :  { %v230_v46 = vadd.f32 %v666_v44, %v664_v45 }
 0x214   :  { %v206_v35 = vpop.permute.xlu1 %205  ;;  %v246_v54 = vadd.f32 %v668_v49, %v230_v46 }
 0x215   :  { %vm209_vm6 = vcmp.gt.f32.partialorder %v206_v35, %v928_v25 }
 0x216   :  { %v665_v50 = vsel %vm209_vm6, 1.0, %v833_v6 }
 0x219   :  { %v222_v36 = vpop.permute.xlu1 %221 }
 0x21a   :  { %vm225_vm4 = vcmp.gt.f32.partialorder %v222_v36, %v928_v25 }
 0x21b   :  { %v667_v47 = vsel %vm225_vm4, 1.0, %v833_v6 }
 0x21c   :  { %v231_v53 = vadd.f32 %v667_v47, %v665_v50 }
 0x21e   :  { %v250_v37 = vpop.permute.xlu1 %249 }
 0x21f   :  { %vm256_vm7 = vcmp.gt.f32.partialorder %v250_v37, %v924_v20 }
 0x220   :  { %v670_v51 = vsel %vm256_vm7, 1.0, %v833_v6 }
 0x221   :  { %v262_v57 = vadd.f32 %v670_v51, %v246_v54 }
 0x223   :  { %v238_v38 = vpop.permute.xlu1 %237 }
 0x224   :  { %vm241_vm8 = vcmp.gt.f32.partialorder %v238_v38, %v928_v25 }
 0x225   :  { %v669_v52 = vsel %vm241_vm8, 1.0, %v833_v6 }
 0x226   :  { %v247_v58 = vadd.f32 %v669_v52, %v231_v53 }
 0x228   :  { %v266_v39 = vpop.permute.xlu1 %265 }
 0x229   :  { %vm272_vm9 = vcmp.gt.f32.partialorder %v266_v39, %v924_v20 }
 0x22a   :  { %v672_v55 = vsel %vm272_vm9, 1.0, %v833_v6 }
 0x22b   :  { %v278_v62 = vadd.f32 %v672_v55, %v262_v57  ;;  %v621_v57 = vld [vmem:[%s1025_s3] sm:$0xff] }
 0x22d   :  { %v254_v40 = vpop.permute.xlu1 %253 }
 0x22e   :  { %vm257_vm10 = vcmp.gt.f32.partialorder %v254_v40, %v928_v25 }
 0x22f   :  { %v671_v56 = vsel %vm257_vm10, 1.0, %v833_v6 }
 0x230   :  { %v263_v63 = vadd.f32 %v671_v56, %v247_v58  ;;  %v631_v56 = vld [vmem:[%s1026_s4] sm:$0xff]  ;;  %s844_s4 = smov [#allocation5]  }
 0x231   :  { %s648_s3 = sshll.u32 %s844_s4, 4  ;;  %s649_s3 = int_to_ptr.vmem [resolvable:$true] %s648_s3 }
 0x232   :  { %v282_v41 = vpop.permute.xlu1 %281  ;;  %s804_s15 = scalar_lea.vmem %s649_s3, 256  ;;  %p809_p9 = scmp.lt.s32.totalorder %s649_s3, %s649_s3 }
 0x233   :  { %vm288_vm11 = vcmp.gt.f32.partialorder %v282_v41, %v924_v20  ;;  %p805_p8 = scmp.ne.s32.totalorder %s649_s3, %s804_s15  ;;  %p810_p10 = scmp.lt.s32.totalorder %s804_s15, %s804_s15 }
 0x234   :  { %v674_v60 = vsel %vm288_vm11, 1.0, %v833_v6 }
 0x235   :  { %v294_v5 = vadd.f32 %v674_v60, %v278_v62  ;;  %p811_p11 = por %p810_p10, %p809_p9 }
 0x237   :  { %v270_v43 = vpop.permute.xlu1 %269  ;;  %p812_p12 = pnand %p811_p11, %p805_p8 }
 0x238   :  { %vm273_vm12 = vcmp.gt.f32.partialorder %v270_v43, %v928_v25 }
 0x239   :  { %v673_v61 = vsel %vm273_vm12, 1.0, %v833_v6 }
 0x23a   :  { %v279_v7 = vadd.f32 %v673_v61, %v263_v63 }
 0x23c   :  { %v298_v48 = vpop.permute.xlu1 %297 }
 0x23d   :  { %vm304_vm13 = vcmp.gt.f32.partialorder %v298_v48, %v924_v20 }
 0x23e   :  { %v676_v3 = vsel %vm304_vm13, 1.0, %v833_v6 }
 0x23f   :  { %v310_v9 = vadd.f32 %v676_v3, %v294_v5 }
 0x241   :  { %v286_v59 = vpop.permute.xlu1 %285 }
 0x242   :  { %vm289_vm14 = vcmp.gt.f32.partialorder %v286_v59, %v928_v25 }
 0x243   :  { %v675_v4 = vsel %vm289_vm14, 1.0, %v833_v6 }
 0x244   :  { %v295_v10 = vadd.f32 %v675_v4, %v279_v7 }
 0x246   :  { %v314_v8 = vpop.permute.xlu1 %313  ;;  %v311_v15 = vadd.f32 %v677_v13, %v295_v10 }
 0x247   :  { %vm320_vm2 = vcmp.gt.f32.partialorder %v314_v8, %v924_v20 }
 0x248   :  { %v678_v11 = vsel %vm320_vm2, 1.0, %v833_v6 }
 0x249   :  { %v326_v12 = vadd.f32 %v678_v11, %v310_v9 }
 0x24a   :  { %v318_v14 = vpop.permute.xlu1 %317 }
 0x24b   :  { %vm321_vm4 = vcmp.gt.f32.partialorder %v318_v14, %v928_v25  ;;  %vm328_vm5 = vcmp.lt.f32.partialorder %v326_v12, 4.0 }
 0x24c   :  { %v679_v16 = vsel %vm321_vm4, 1.0, %v833_v6  ;;  %v680_v17 = vsel %vm328_vm5, 1.0, %v833_v6 }
 0x24d   :  { %v327_v18 = vadd.f32 %v679_v16, %v311_v15  ;;  %v427_v19 = vsel %vm426_vm3, %v680_v17, 0.0 }
 0x24e   :  { %428 = vadd.xlane.f32.xlu1 %v427_v19 }
 0x24f   :  { %vm329_vm6 = vcmp.lt.f32.partialorder %v327_v18, 4.0 }
 0x250   :  { %v681_v20 = vsel %vm329_vm6, 1.0, %v833_v6 }
 0x251   :  { %v430_v21 = vsel %vm426_vm3, %v681_v20, 0.0 }
 0x252   :  { %431 = vadd.xlane.f32.xlu0 %v430_v21 }
 0x2db   :  { %v429_v24 = vpop.xlane.xlu1 %428 }
 0x2dc   :  { %v433_v26 = vmax.f32 %v429_v24, 1.0 }
 0x2de   :  { %776 = vrsqrt.f32 %v433_v26 }
 0x2df   :  { %v432_v25 = vpop.xlane.xlu0 %431 }
 0x2e0   :  { %v434_v27 = vmax.f32 %v432_v25, 1.0 }
 0x2e2   :  { %778 = vrsqrt.f32 %v434_v27 }
 0x2e8   :  { %v777_v30 = vpop.eup %776 }
 0x2e9   :  { %v437_v31 = vmul.f32 %v777_v30, %v418_v29 }
 0x2eb   :  { %440 = vrot.lane.b32.xlu0 %v437_v31, %s843_s11 }
 0x2ec   :  { %v779_v33 = vpop.eup %778 }
 0x2ed   :  { %v438_v34 = vmul.f32 %v779_v33, %v423_v32 }
 0x2ef   :  { %517 = vrot.lane.b32.xlu1 %v438_v34, %s843_s11 }
 0x35d   :  { %v441_v35 = vpop.permute.xlu0 %440 }
 0x35e   :  { %723 = vmatpush3.msra.mxu1 %v441_v35 }
 0x35f   :  { %725 = vmatmul.mubr.msk.f32.vlgmr.msra.gmra.mrb[2].mxu1 %vm426_vm3, %v680_v17  ;;  %727 = vmatprep.subr.mxu1 %v833_v6 }
 0x360   :  { %729 = vmatprep.mubr.msk.f32.mxu1 %vm834_vm1, %v833_v6 }
 0x361   :  { %v518_v36 = vpop.permute.xlu1 %517 }
 0x362   :  { %728 = vmatpush3.msra.mxu1 %v518_v36 }
 0x363   :  { %730 = vmatmul.mubr.msk.f32.vlgmr.msra.gmra.mrb[4].mxu1 %vm426_vm3, %v681_v20 }
 0x432   :  { %v512_v37 = vpop.f32.mrb[2].mxu1 }
 0x433   :  { %v593_v38 = vmul.f32 %v777_v30, %v512_v37  ;;  %v726_v39 = vpop.f32.mrb[3].mxu1 }
 0x435   :  { %v595_v40 = vadd.f32 %v593_v38, %v418_v29 }
 0x436   :  { %v589_v41 = vpop.f32.mrb[4].mxu1 }
 0x437   :  { %v594_v42 = vmul.f32 %v779_v33, %v589_v41  ;;  %v731_v43 = vpop.f32.mrb[5].mxu1  ;;  %v597_v44 = vsel %vm39_vm0, %v595_v40, 0.0 }
 0x438   :  { %598 = vadd.xlane.f32.xlu1 %v597_v44 }
 0x439   :  { %v596_v45 = vadd.f32 %v594_v42, %v423_v32 }
 0x43b   :  { %v600_v46 = vsel %vm39_vm0, %v596_v45, 0.0 }
 0x43c   :  { %601 = vadd.xlane.f32.xlu0 %v600_v46 }
 0x4c5   :  { %v599_v47 = vpop.xlane.xlu1 %598 }
 0x4c9   :  { %v602_v6 = vpop.xlane.xlu0 %601 }
 0x4ca   :  { %v603_v48 = vadd.f32 %v602_v6, %v599_v47 }
 0x4cc   :  { %v604_v49 = vmul.f32 0.015625, %v603_v48 }
 0x4ce   :  { %v605_v50 = vsub.f32 %v595_v40, %v604_v49  ;;  %v606_v51 = vsub.f32 %v596_v45, %v604_v49 }
 0x4d0   :  { %v608_v52 = vmul.f32 %v606_v51, %v606_v51  ;;  %v607_v53 = vmul.f32 %v605_v50, %v605_v50 }
 0x4d2   :  { %v612_v54 = vsel %vm39_vm0, %v608_v52, 0.0  ;;  %v609_v55 = vsel %vm39_vm0, %v607_v53, 0.0 }
 0x4d3   :  { %613 = vadd.xlane.f32.xlu1 %v612_v54  ;;  %610 = vadd.xlane.f32.xlu0 %v609_v55 }
 0x4e4   :  { %634 = vperm.xlu1 %771, %v631_v56  }
 0x4e9   :  { %624 = vperm.xlu0 %770, %v621_v57  }
 0x560   :  { %v614_v58 = vpop.xlane.xlu1 %613  ;;  %v611_v59 = vpop.xlane.xlu0 %610 }
 0x561   :  { %v615_v60 = vadd.f32 %v614_v58, %v611_v59 }
 0x563   :  { %v616_v61 = vmul.f32 0.015625, %v615_v60 }
 0x564   :  { %v635_v8 = vpop.permute.xlu1 %634 }
 0x565   :  { %v617_v62 = vadd.f32 1e-05, %v616_v61 }
 0x567   :  { %780 = vrsqrt.f32 %v617_v62 }
 0x568   :  { %v625_v2 = vpop.permute.xlu0 %624 }
 0x571   :  { %v781_v63 = vpop.eup %780 }
 0x572   :  { %v619_v3 = vmul.f32 %v781_v63, %v605_v50  ;;  %v620_v4 = vmul.f32 %v781_v63, %v606_v51 }
 0x574   :  { %v627_v5 = vmul.f32 %v625_v2, %v619_v3  ;;  %v628_v7 = vmul.f32 %v625_v2, %v620_v4 }
 0x576   :  { %v629_v9 = vadd.f32 %v627_v5, %v893_v0  ;;  %v630_v10 = vadd.f32 %v628_v7, %v898_v1 }
 0x578   :  { %v637_v11 = vadd.f32 %v635_v8, %v629_v9  ;;  %v638_v12 = vadd.f32 %v635_v8, %v630_v10 }
 0x57a   :  { %v639_v13 = vmax.f32 %v637_v11, 0.0  ;;  %v640_v14 = vmax.f32 %v638_v12, 0.0 }
 0x57c   :  { %641 = vst.msk [vmem:[#allocation5] sm:$0xff] %vm39_vm0, %v639_v13  ;;  %642 = vst.msk [vmem:[#allocation5 + $0x8] sm:$0xff] %vm39_vm0, %v640_v14 }
 0x57d   :  { %815 = shalt.err (!%p812_p12)
}
 0x57e   :  { %s816_s18 = scalar_lea.hbm %s1027_s5, 256 }
 0x57f   :  { %p817_p13 = scmp.ne.s32.totalorder %s1027_s5, %s816_s18  ;;  %p820_p0 = scmp.lt.u32.totalorder %s816_s18, %s1027_s5 }
 0x581   :  { %p822_p1 = pnand %p820_p0, %p817_p13 }
 0x583   :  { %825 = shalt.err (!%p822_p1)
}
 0x584   :  { %654 = dma.vmem_to_hbm [thread:$0]  %s649_s3, 256, %s1027_s5, [#allocation4], %s831_s28, %s831_s28, %s832_s29  }
 0x585   :  { %828 = dma.done.wait [#allocation4], 256  }
 0x586   :  { %829 = vsyncadd [#allocation4], 4294967040 }
 0x587   :  { %658 = vsyncpa [#allocation3], 1 }
 0x588   :  { %659 = vsyncpa [#allocation4], 1 }

</bundles_post_ra>
